<compile_context>
chip_gen: v6e
topology: v6e:2x2x1
jax: 0.10.0
libtpu: 0.0.40
codegen_flags: <defaults>
</compile_context>

<pallas_src>
import functools

import jax
import jax.numpy as jnp
import numpy as np
from jax import lax
from jax.experimental import pallas as pl
from jax.experimental.pallas import tpu as pltpu

BN_EPS = 1e-5


def _pick_row_tile(L, target_rows):
    """Largest divisor tr of L with tr*L <= target_rows (tile = tr image rows)."""
    divs = [d for d in range(1, L + 1) if L % d == 0]
    fit = [d for d in divs if d * L <= target_rows]
    return max(fit) if fit else 1


def _conv_stats_kernel(xp_ref, w_ref, y_ref, psum_ref, psq_ref,
                       *, tr, L, C, Cout, dil):
    """Fused 4-neighbour gather + 1x1 conv + partial BN stats for one row tile.

    xp_ref : (1, L+dil, L+dil, C) bf16   resident padded image of sample n
    w_ref  : (4, C, Cout)        bf16    neighbour-major conv weight (resident)
    y_ref  : (1, tr, L, Cout)    bf16    conv output tile
    psum/psq : (1, 1, 1, Cout)   f32     per-tile column sum / sum of squares
    """
    rb = pl.program_id(1)
    r0 = pl.multiple_of(rb * tr, tr)

    # (tr+dil, L+dil, C) window of the resident padded image.
    xv = xp_ref[0, pl.ds(r0, tr + dil), :, :]

    # Four shifted neighbour views (static slices, all in VMEM):
    #   output pixel (r, c) needs x[r, c-dil], x[r, c], x[r+dil, c-dil],
    #   x[r+dil, c]; xp is padded bottom/left by dil so these are plain shifts.
    n0 = xv[:tr, :L, :].reshape(tr * L, C)       # (r      , c - dil)
    n1 = xv[:tr, dil:, :].reshape(tr * L, C)     # (r      , c      )
    n2 = xv[dil:, :L, :].reshape(tr * L, C)      # (r + dil, c - dil)
    n3 = xv[dil:, dil:, :].reshape(tr * L, C)    # (r + dil, c      )

    # y = sum_k n_k @ W_k  (bf16 inputs, f32 accumulation on the MXU).
    y = jnp.dot(n0, w_ref[0], preferred_element_type=jnp.float32)
    y = y + jnp.dot(n1, w_ref[1], preferred_element_type=jnp.float32)
    y = y + jnp.dot(n2, w_ref[2], preferred_element_type=jnp.float32)
    y = y + jnp.dot(n3, w_ref[3], preferred_element_type=jnp.float32)

    # Batch-norm partials from the exact f32 accumulator.
    psum_ref[...] = jnp.sum(y, axis=0).reshape(1, 1, 1, Cout)
    psq_ref[...] = jnp.sum(y * y, axis=0).reshape(1, 1, 1, Cout)

    # Store the conv output in bf16 (halves HBM writeback + re-read in call B).
    y_ref[...] = y.astype(y_ref.dtype).reshape(1, tr, L, Cout)


def _bn_relu_kernel(y_ref, scale_ref, shift_ref, o_ref):
    """Elementwise folded BatchNorm affine + ReLU (bf16 in, f32 out)."""
    y = y_ref[...].astype(jnp.float32)
    o_ref[...] = jnp.maximum(y * scale_ref[...] + shift_ref[...], 0.0)


@functools.partial(jax.jit, static_argnames=("dil",))
def stage2_forward(x, conv_w, gamma, beta, dil):
    """x: (N, L, L, C) f32, conv_w: (Cout, 4C, 1, 1) -> (N, L, L, Cout) f32."""
    N, L, L2, C = x.shape
    assert L == L2
    Cout = conv_w.shape[0]
    assert conv_w.shape[1] == 4 * C
    K = 4 * C
    M = N * L * L

    # Pad bottom rows / left cols by dil (matches the gather offsets) in bf16.
    xp = jnp.pad(x.astype(jnp.bfloat16), ((0, 0), (0, dil), (dil, 0), (0, 0)))

    # PyTorch in-channel index is c*4 + k; re-pack to neighbour-major
    # (4, C, Cout) so each neighbour's weight slice is a contiguous block.
    w3 = jnp.transpose(conv_w.astype(jnp.bfloat16).reshape(Cout, C, 4), (2, 1, 0))

    # ---- call A: fused gather + conv + partial batch stats ---------------
    tr_a = _pick_row_tile(L, 512)          # ~512 output rows per MXU call
    rb_a = L // tr_a

    kernel_a = functools.partial(_conv_stats_kernel,
                                 tr=tr_a, L=L, C=C, Cout=Cout, dil=dil)

    cost_a = pl.CostEstimate(
        flops=2 * M * K * Cout,
        transcendentals=0,
        bytes_accessed=int(xp.size * 2 + w3.size * 2
                           + M * Cout * 2 + 2 * N * rb_a * Cout * 4))

    y, psum, psq = pl.pallas_call(
        kernel_a,
        out_shape=(
            jax.ShapeDtypeStruct((N, L, L, Cout), jnp.bfloat16),     # y (bf16)
            jax.ShapeDtypeStruct((N, rb_a, 1, Cout), jnp.float32),   # partial sum
            jax.ShapeDtypeStruct((N, rb_a, 1, Cout), jnp.float32),   # partial sumsq
        ),
        grid_spec=pltpu.PrefetchScalarGridSpec(
            num_scalar_prefetch=0,
            grid=(N, rb_a),
            in_specs=[
                # Whole padded image per sample; index ignores rb -> resident.
                pl.BlockSpec((1, L + dil, L + dil, C), lambda n, rb: (n, 0, 0, 0)),
                # Whole weight, constant index -> DMA'd once for the kernel.
                pl.BlockSpec((4, C, Cout), lambda n, rb: (0, 0, 0)),
            ],
            out_specs=[
                pl.BlockSpec((1, tr_a, L, Cout), lambda n, rb: (n, rb, 0, 0)),
                pl.BlockSpec((1, 1, 1, Cout), lambda n, rb: (n, rb, 0, 0)),
                pl.BlockSpec((1, 1, 1, Cout), lambda n, rb: (n, rb, 0, 0)),
            ],
        ),
        compiler_params=pltpu.CompilerParams(
            dimension_semantics=("parallel", "parallel"),
            vmem_limit_bytes=48 * 1024 * 1024),
        cost_estimate=cost_a,
    )(xp, w3)

    # ---- train-mode BatchNorm2d statistics (exact f32 partials) ----------
    # TODO(synk): switch to per-tile centered sums (Welford-style combine) if
    #             M grows enough for E[y^2]-mean^2 cancellation to matter.
    g = gamma.astype(jnp.float32)
    b = beta.astype(jnp.float32)
    m_true = jnp.float32(M)
    mean = jnp.sum(psum, axis=(0, 1, 2)) / m_true
    var = jnp.sum(psq, axis=(0, 1, 2)) / m_true - mean * mean   # biased (train BN)
    var = jnp.maximum(var, 0.0)                                 # cancellation guard
    inv_std = lax.rsqrt(var + BN_EPS)
    scale = (g * inv_std).reshape(1, 1, 1, Cout)
    shift = (b - mean * g * inv_std).reshape(1, 1, 1, Cout)

    # ---- call B: folded BN affine + ReLU (elementwise, HBM-bound) --------
    tr_b = _pick_row_tile(L, 1024)         # bigger tiles for the memcpy-like pass
    rb_b = L // tr_b
    out = pl.pallas_call(
        _bn_relu_kernel,
        out_shape=jax.ShapeDtypeStruct((N, L, L, Cout), jnp.float32),
        grid_spec=pltpu.PrefetchScalarGridSpec(
            num_scalar_prefetch=0,
            grid=(N, rb_b),
            in_specs=[
                pl.BlockSpec((1, tr_b, L, Cout), lambda n, rb: (n, rb, 0, 0)),
                pl.BlockSpec((1, 1, 1, Cout), lambda n, rb: (0, 0, 0, 0)),
                pl.BlockSpec((1, 1, 1, Cout), lambda n, rb: (0, 0, 0, 0)),
            ],
            out_specs=pl.BlockSpec((1, tr_b, L, Cout), lambda n, rb: (n, rb, 0, 0)),
        ),
        compiler_params=pltpu.CompilerParams(
            dimension_semantics=("parallel", "parallel"),
            vmem_limit_bytes=48 * 1024 * 1024),
    )(y, scale, shift)

    return out


# ---------------------------------------------------------------------------
# Pure-JAX f32 reference (direct translation of the PyTorch forward).
# ---------------------------------------------------------------------------
def _reference_gather(x, dil):
    N, L, _, C = x.shape
    xp = jnp.pad(x, ((0, 0), (dil, dil), (dil, dil), (0, 0)))

    def shifted(dr, dc):
        return lax.dynamic_slice(xp, (0, dil + dr, dil + dc, 0), (N, L, L, C))

    n0 = shifted(0, -dil)
    n1 = shifted(0, 0)
    n2 = shifted(dil, -dil)
    n3 = shifted(dil, 0)
    return jnp.stack([n0, n1, n2, n3], axis=-1).reshape(N, L, L, 4 * C)  # c*4+k


def stage2_reference(x, conv_w, gamma, beta, dil):
    feat = _reference_gather(x, dil)                       # (N, L, L, 4C)
    w2d = conv_w.reshape(conv_w.shape[0], -1)              # (Cout, 4C)
    y = jnp.einsum("nhwk,ok->nhwo", feat, w2d)
    mean = y.mean(axis=(0, 1, 2))
    var = y.var(axis=(0, 1, 2))                            # biased (train-mode BN)
    yn = (y - mean) / jnp.sqrt(var + BN_EPS) * gamma + beta
    return jnp.maximum(yn, 0.0)


if __name__ == "__main__":
    # Small stand-in for the real sizes (N, 60, 60, 512) with a 2048-wide conv.
    N, L, C, dil = 2, 8, 8, 2
    Cio = 4 * C   # conv in/out channels (=32 here, =2048 in the real module)

    key = jax.random.PRNGKey(0)
    k1, k2 = jax.random.split(key)
    x = jax.random.normal(k1, (N, L, L, C), dtype=jnp.float32)
    conv_w = jax.random.normal(k2, (Cio, Cio, 1, 1), dtype=jnp.float32) * 0.05
    gamma = jnp.ones((Cio,), jnp.float32)   # BatchNorm2d default weight
    beta = jnp.zeros((Cio,), jnp.float32)   # BatchNorm2d default bias

    out = jax.block_until_ready(stage2_forward(x, conv_w, gamma, beta, dil))

    ref = stage2_reference(x, conv_w, gamma, beta, dil)
    assert out.shape == (N, L, L, Cio), out.shape
    # Tolerance accounts for bf16 inputs / bf16 y intermediate (f32 MXU accum).
    np.testing.assert_allclose(np.asarray(out), np.asarray(ref),
                               rtol=3e-2, atol=3e-2)
    print("KERNEL_OK")
</pallas_src>

<mosaic_0001>
module attributes {stable_mosaic.version = 11 : i64} {
  func.func @_conv_stats_kernel(%arg0: i32, %arg1: i32, %arg2: memref<1x10x10x8xbf16, #tpu.memory_space<vmem>>, %arg3: memref<4x8x32xbf16, #tpu.memory_space<vmem>>, %arg4: memref<1x8x8x32xbf16, #tpu.memory_space<vmem>>, %arg5: memref<1x1x1x32xf32, #tpu.memory_space<vmem>>, %arg6: memref<1x1x1x32xf32, #tpu.memory_space<vmem>>) attributes {dimension_semantics = [#tpu.dimension_semantics<parallel>, #tpu.dimension_semantics<parallel>], iteration_bounds = array<i64: 2, 1>, scalar_prefetch = 0 : i64, scratch_operands = 0 : i64, tpu.core_type = #tpu.core_type<tc>, window_params = [{transform_indices = @transform_0, window_bounds = array<i64: 1, 10, 10, 8>}, {pipeline_mode = #tpu.pipeline_mode<synchronous>, transform_indices = @transform_1, window_bounds = array<i64: 4, 8, 32>}, {transform_indices = @transform_2, window_bounds = array<i64: 1, 8, 8, 32>}, {transform_indices = @transform_3, window_bounds = array<i64: 1, 1, 1, 32>}, {transform_indices = @transform_4, window_bounds = array<i64: 1, 1, 1, 32>}]} {
    %c8_i32 = arith.constant 8 : i32
    %0 = arith.muli %arg1, %c8_i32 : i32
    %1 = tpu.assume_multiple %0, 8 : i32
    %c0 = arith.constant 0 : index
    %2 = arith.index_cast %1 : i32 to index
    %c0_0 = arith.constant 0 : index
    %c0_1 = arith.constant 0 : index
    %3 = vector.load %arg2[%c0, %2, %c0_0, %c0_1] : memref<1x10x10x8xbf16, #tpu.memory_space<vmem>>, vector<1x10x10x8xbf16>
    %4 = vector.shape_cast %3 : vector<1x10x10x8xbf16> to vector<10x10x8xbf16>
    %5 = vector.extract_strided_slice %4 {offsets = [0, 0, 0], sizes = [8, 8, 8], strides = [1, 1, 1]} : vector<10x10x8xbf16> to vector<8x8x8xbf16>
    %6 = vector.shape_cast %5 : vector<8x8x8xbf16> to vector<64x8xbf16>
    %7 = vector.extract_strided_slice %4 {offsets = [0, 2, 0], sizes = [8, 8, 8], strides = [1, 1, 1]} : vector<10x10x8xbf16> to vector<8x8x8xbf16>
    %8 = vector.shape_cast %7 : vector<8x8x8xbf16> to vector<64x8xbf16>
    %9 = vector.extract_strided_slice %4 {offsets = [2, 0, 0], sizes = [8, 8, 8], strides = [1, 1, 1]} : vector<10x10x8xbf16> to vector<8x8x8xbf16>
    %10 = vector.shape_cast %9 : vector<8x8x8xbf16> to vector<64x8xbf16>
    %11 = vector.extract_strided_slice %4 {offsets = [2, 2, 0], sizes = [8, 8, 8], strides = [1, 1, 1]} : vector<10x10x8xbf16> to vector<8x8x8xbf16>
    %12 = vector.shape_cast %11 : vector<8x8x8xbf16> to vector<64x8xbf16>
    %c0_2 = arith.constant 0 : index
    %c0_3 = arith.constant 0 : index
    %c0_4 = arith.constant 0 : index
    %13 = vector.load %arg3[%c0_2, %c0_3, %c0_4] : memref<4x8x32xbf16, #tpu.memory_space<vmem>>, vector<1x8x32xbf16>
    %14 = vector.shape_cast %13 : vector<1x8x32xbf16> to vector<8x32xbf16>
    %cst = arith.constant dense<0.000000e+00> : vector<64x32xf32>
    %15 = tpu.matmul %6, %14, %cst {dimension_numbers = #tpu.dot_dimension_numbers<[1], [0], [0], [1], [0, 0, 1, 1], [], []>} : vector<64x8xbf16>, vector<8x32xbf16>, vector<64x32xf32> -> vector<64x32xf32>
    %c1 = arith.constant 1 : index
    %c0_5 = arith.constant 0 : index
    %c0_6 = arith.constant 0 : index
    %16 = vector.load %arg3[%c1, %c0_5, %c0_6] : memref<4x8x32xbf16, #tpu.memory_space<vmem>>, vector<1x8x32xbf16>
    %17 = vector.shape_cast %16 : vector<1x8x32xbf16> to vector<8x32xbf16>
    %cst_7 = arith.constant dense<0.000000e+00> : vector<64x32xf32>
    %18 = tpu.matmul %8, %17, %cst_7 {dimension_numbers = #tpu.dot_dimension_numbers<[1], [0], [0], [1], [0, 0, 1, 1], [], []>} : vector<64x8xbf16>, vector<8x32xbf16>, vector<64x32xf32> -> vector<64x32xf32>
    %19 = arith.addf %15, %18 : vector<64x32xf32>
    %c2 = arith.constant 2 : index
    %c0_8 = arith.constant 0 : index
    %c0_9 = arith.constant 0 : index
    %20 = vector.load %arg3[%c2, %c0_8, %c0_9] : memref<4x8x32xbf16, #tpu.memory_space<vmem>>, vector<1x8x32xbf16>
    %21 = vector.shape_cast %20 : vector<1x8x32xbf16> to vector<8x32xbf16>
    %cst_10 = arith.constant dense<0.000000e+00> : vector<64x32xf32>
    %22 = tpu.matmul %10, %21, %cst_10 {dimension_numbers = #tpu.dot_dimension_numbers<[1], [0], [0], [1], [0, 0, 1, 1], [], []>} : vector<64x8xbf16>, vector<8x32xbf16>, vector<64x32xf32> -> vector<64x32xf32>
    %23 = arith.addf %19, %22 : vector<64x32xf32>
    %c3 = arith.constant 3 : index
    %c0_11 = arith.constant 0 : index
    %c0_12 = arith.constant 0 : index
    %24 = vector.load %arg3[%c3, %c0_11, %c0_12] : memref<4x8x32xbf16, #tpu.memory_space<vmem>>, vector<1x8x32xbf16>
    %25 = vector.shape_cast %24 : vector<1x8x32xbf16> to vector<8x32xbf16>
    %cst_13 = arith.constant dense<0.000000e+00> : vector<64x32xf32>
    %26 = tpu.matmul %12, %25, %cst_13 {dimension_numbers = #tpu.dot_dimension_numbers<[1], [0], [0], [1], [0, 0, 1, 1], [], []>} : vector<64x8xbf16>, vector<8x32xbf16>, vector<64x32xf32> -> vector<64x32xf32>
    %27 = arith.addf %23, %26 : vector<64x32xf32>
    %cst_14 = arith.constant dense<0.000000e+00> : vector<32xf32>
    %28 = vector.multi_reduction <add>, %27, %cst_14 [0] : vector<64x32xf32> to vector<32xf32>
    %29 = vector.shape_cast %28 : vector<32xf32> to vector<1x1x1x32xf32>
    %c0_15 = arith.constant 0 : index
    %c0_16 = arith.constant 0 : index
    %c0_17 = arith.constant 0 : index
    %c0_18 = arith.constant 0 : index
    %30 = vector.load %arg5[%c0_15, %c0_16, %c0_17, %c0_18] : memref<1x1x1x32xf32, #tpu.memory_space<vmem>>, vector<1x1x1x32xf32>
    tpu.vector_store %arg5[%c0_15, %c0_16, %c0_17, %c0_18], %29 {strides = array<i32>} : memref<1x1x1x32xf32, #tpu.memory_space<vmem>>, vector<1x1x1x32xf32>,
    %31 = arith.mulf %27, %27 : vector<64x32xf32>
    %cst_19 = arith.constant dense<0.000000e+00> : vector<32xf32>
    %32 = vector.multi_reduction <add>, %31, %cst_19 [0] : vector<64x32xf32> to vector<32xf32>
    %33 = vector.shape_cast %32 : vector<32xf32> to vector<1x1x1x32xf32>
    %c0_20 = arith.constant 0 : index
    %c0_21 = arith.constant 0 : index
    %c0_22 = arith.constant 0 : index
    %c0_23 = arith.constant 0 : index
    %34 = vector.load %arg6[%c0_20, %c0_21, %c0_22, %c0_23] : memref<1x1x1x32xf32, #tpu.memory_space<vmem>>, vector<1x1x1x32xf32>
    tpu.vector_store %arg6[%c0_20, %c0_21, %c0_22, %c0_23], %33 {strides = array<i32>} : memref<1x1x1x32xf32, #tpu.memory_space<vmem>>, vector<1x1x1x32xf32>,
    %35 = arith.truncf %27 : vector<64x32xf32> to vector<64x32xbf16>
    %36 = vector.shape_cast %35 : vector<64x32xbf16> to vector<1x8x8x32xbf16>
    %c0_24 = arith.constant 0 : index
    %c0_25 = arith.constant 0 : index
    %c0_26 = arith.constant 0 : index
    %c0_27 = arith.constant 0 : index
    %37 = vector.load %arg4[%c0_24, %c0_25, %c0_26, %c0_27] : memref<1x8x8x32xbf16, #tpu.memory_space<vmem>>, vector<1x8x8x32xbf16>
    tpu.vector_store %arg4[%c0_24, %c0_25, %c0_26, %c0_27], %36 {strides = array<i32>} : memref<1x8x8x32xbf16, #tpu.memory_space<vmem>>, vector<1x8x8x32xbf16>,
    return
  }
  func.func @transform_0(%arg0: i32, %arg1: i32) -> (i32, i32, i32, i32) {
    %c0_i32 = arith.constant 0 : i32
    %c0_i32_0 = arith.constant 0 : i32
    %c0_i32_1 = arith.constant 0 : i32
    %c0_i32_2 = arith.constant 0 : i32
    return %arg0, %c0_i32, %c0_i32_0, %c0_i32_1 : i32, i32, i32, i32
  }
  func.func @transform_1(%arg0: i32, %arg1: i32) -> (i32, i32, i32) {
    %c0_i32 = arith.constant 0 : i32
    %c0_i32_0 = arith.constant 0 : i32
    %c0_i32_1 = arith.constant 0 : i32
    %c0_i32_2 = arith.constant 0 : i32
    return %c0_i32, %c0_i32_0, %c0_i32_1 : i32, i32, i32
  }
  func.func @transform_2(%arg0: i32, %arg1: i32) -> (i32, i32, i32, i32) {
    %c0_i32 = arith.constant 0 : i32
    %c0_i32_0 = arith.constant 0 : i32
    %c0_i32_1 = arith.constant 0 : i32
    return %arg0, %arg1, %c0_i32, %c0_i32_0 : i32, i32, i32, i32
  }
  func.func @transform_3(%arg0: i32, %arg1: i32) -> (i32, i32, i32, i32) {
    %c0_i32 = arith.constant 0 : i32
    %c0_i32_0 = arith.constant 0 : i32
    %c0_i32_1 = arith.constant 0 : i32
    return %arg0, %arg1, %c0_i32, %c0_i32_0 : i32, i32, i32, i32
  }
  func.func @transform_4(%arg0: i32, %arg1: i32) -> (i32, i32, i32, i32) {
    %c0_i32 = arith.constant 0 : i32
    %c0_i32_0 = arith.constant 0 : i32
    %c0_i32_1 = arith.constant 0 : i32
    return %arg0, %arg1, %c0_i32, %c0_i32_0 : i32, i32, i32, i32
  }
}

module attributes {stable_mosaic.version = 11 : i64} {
  func.func @_bn_relu_kernel(%arg0: i32, %arg1: i32, %arg2: memref<1x8x8x32xbf16, #tpu.memory_space<vmem>>, %arg3: memref<1x1x1x32xf32, #tpu.memory_space<vmem>>, %arg4: memref<1x1x1x32xf32, #tpu.memory_space<vmem>>, %arg5: memref<1x8x8x32xf32, #tpu.memory_space<vmem>>) attributes {dimension_semantics = [#tpu.dimension_semantics<parallel>, #tpu.dimension_semantics<parallel>], iteration_bounds = array<i64: 2, 1>, scalar_prefetch = 0 : i64, scratch_operands = 0 : i64, tpu.core_type = #tpu.core_type<tc>, window_params = [{transform_indices = @transform_0, window_bounds = array<i64: 1, 8, 8, 32>}, {pipeline_mode = #tpu.pipeline_mode<synchronous>, transform_indices = @transform_1, window_bounds = array<i64: 1, 1, 1, 32>}, {pipeline_mode = #tpu.pipeline_mode<synchronous>, transform_indices = @transform_2, window_bounds = array<i64: 1, 1, 1, 32>}, {transform_indices = @transform_3, window_bounds = array<i64: 1, 8, 8, 32>}]} {
    %c0 = arith.constant 0 : index
    %c0_0 = arith.constant 0 : index
    %c0_1 = arith.constant 0 : index
    %c0_2 = arith.constant 0 : index
    %0 = vector.load %arg2[%c0, %c0_0, %c0_1, %c0_2] : memref<1x8x8x32xbf16, #tpu.memory_space<vmem>>, vector<1x8x8x32xbf16>
    %1 = arith.extf %0 : vector<1x8x8x32xbf16> to vector<1x8x8x32xf32>
    %c0_3 = arith.constant 0 : index
    %c0_4 = arith.constant 0 : index
    %c0_5 = arith.constant 0 : index
    %c0_6 = arith.constant 0 : index
    %2 = vector.load %arg3[%c0_3, %c0_4, %c0_5, %c0_6] : memref<1x1x1x32xf32, #tpu.memory_space<vmem>>, vector<1x1x1x32xf32>
    %3 = vector.broadcast %2 : vector<1x1x1x32xf32> to vector<1x8x8x32xf32>
    %4 = arith.mulf %1, %3 : vector<1x8x8x32xf32>
    %c0_7 = arith.constant 0 : index
    %c0_8 = arith.constant 0 : index
    %c0_9 = arith.constant 0 : index
    %c0_10 = arith.constant 0 : index
    %5 = vector.load %arg4[%c0_7, %c0_8, %c0_9, %c0_10] : memref<1x1x1x32xf32, #tpu.memory_space<vmem>>, vector<1x1x1x32xf32>
    %6 = vector.broadcast %5 : vector<1x1x1x32xf32> to vector<1x8x8x32xf32>
    %7 = arith.addf %4, %6 : vector<1x8x8x32xf32>
    %cst = arith.constant 0.000000e+00 : f32
    %8 = vector.broadcast %cst : f32 to vector<1x8x8x32xf32>
    %9 = arith.maximumf %7, %8 : vector<1x8x8x32xf32>
    %c0_11 = arith.constant 0 : index
    %c0_12 = arith.constant 0 : index
    %c0_13 = arith.constant 0 : index
    %c0_14 = arith.constant 0 : index
    %10 = vector.load %arg5[%c0_11, %c0_12, %c0_13, %c0_14] : memref<1x8x8x32xf32, #tpu.memory_space<vmem>>, vector<1x8x8x32xf32>
    tpu.vector_store %arg5[%c0_11, %c0_12, %c0_13, %c0_14], %9 {strides = array<i32>} : memref<1x8x8x32xf32, #tpu.memory_space<vmem>>, vector<1x8x8x32xf32>,
    return
  }
  func.func @transform_0(%arg0: i32, %arg1: i32) -> (i32, i32, i32, i32) {
    %c0_i32 = arith.constant 0 : i32
    %c0_i32_0 = arith.constant 0 : i32
    %c0_i32_1 = arith.constant 0 : i32
    return %arg0, %arg1, %c0_i32, %c0_i32_0 : i32, i32, i32, i32
  }
  func.func @transform_1(%arg0: i32, %arg1: i32) -> (i32, i32, i32, i32) {
    %c0_i32 = arith.constant 0 : i32
    %c0_i32_0 = arith.constant 0 : i32
    %c0_i32_1 = arith.constant 0 : i32
    %c0_i32_2 = arith.constant 0 : i32
    %c0_i32_3 = arith.constant 0 : i32
    return %c0_i32, %c0_i32_0, %c0_i32_1, %c0_i32_2 : i32, i32, i32, i32
  }
  func.func @transform_2(%arg0: i32, %arg1: i32) -> (i32, i32, i32, i32) {
    %c0_i32 = arith.constant 0 : i32
    %c0_i32_0 = arith.constant 0 : i32
    %c0_i32_1 = arith.constant 0 : i32
    %c0_i32_2 = arith.constant 0 : i32
    %c0_i32_3 = arith.constant 0 : i32
    return %c0_i32, %c0_i32_0, %c0_i32_1, %c0_i32_2 : i32, i32, i32, i32
  }
  func.func @transform_3(%arg0: i32, %arg1: i32) -> (i32, i32, i32, i32) {
    %c0_i32 = arith.constant 0 : i32
    %c0_i32_0 = arith.constant 0 : i32
    %c0_i32_1 = arith.constant 0 : i32
    return %arg0, %arg1, %c0_i32, %c0_i32_0 : i32, i32, i32, i32
  }
}

</mosaic_0001>

<bundles_post_ra>
// kernel: stage2_forward.3
= control target key start
LH: loop header
LB: loop body
LE: loop exit
PB: predicated region body
PF: predicated region fallthrough
CT: control target
= control target key end

     0   :  { %8 = vsyncpa [#allocation3], 0  ;;  %s695_s0 = inlined_call_operand.vmem [shape: bf16[2,8,8,32], index: 0, kind: input, shape index: {}]   ;;  %s696_s1 = inlined_call_operand.vmem [shape: f32[1,1,1,32], index: 1, kind: input, shape index: {}]   ;;  %s697_s2 = inlined_call_operand.vmem [shape: f32[1,1,1,32], index: 2, kind: input, shape index: {}]   ;;  %s698_s3 = inlined_call_operand.hbm [shape: f32[2,8,8,32], index: 3, kind: output, shape index: {}]  }
   0x1   :  { %10 = vsyncpa [#allocation3 + $0x1], 0  ;;  %s552_s12 = smov 0   ;;  %s554_s13 = smov 0  }
   0x2   :  { %s556_s14 = smov 0   ;;  %s558_s15 = smov 0  }
   0x3   :  { %s560_s16 = smov 0   ;;  %s562_s17 = smov 0  }
   0x4 LB: > { %s358_s18 = sadd.s32 4294967295, %s527_s17   ;;  %s359_s19 = sadd.s32 4294967294, %s527_s17   ;;  %s527_s17 = sphi %s562_s17, %s16_s17   ;;  %s523_s16 = sphi %s560_s16, %s705_s16   ;;  %s519_s15 = sphi %s558_s15, %s704_s15   ;;  %s515_s14 = sphi %s556_s14, %s703_s14   ;;  %s511_s13 = sphi %s554_s13, %s702_s13   ;;  %s507_s12 = sphi %s552_s12, %s701_s12  }
   0x5   : > { %s28_s20 = sadd.s32 1, %s523_s16  ;;  %s107_s21 = sadd.s32 1, %s515_s14 }
   0x6   : > { %p30_p0 = scmp.ge.s32.totalorder %s28_s20, 2  ;;  %p117_p1 = scmp.ne.s32.totalorder %s515_s14, %s511_s13 }
   0x7   : > { %p118_p2 = scmp.eq.s32.totalorder %s358_s18, 1  ;;  %p123_p3 = scmp.ne.s32.totalorder %s511_s13, %s507_s12 }
   0x8   : > { %s707_s20 = smov (%p30_p0, %s28_s20), 0  ;;  %p124_p5 = scmp.eq.s32.totalorder %s359_s19, 1 }
   0x9   : > { %p592_p4 = por %p118_p2, %p117_p1  ;;  %s102_s23 = ssub.s32 %s523_s16, %s707_s20 }
   0xa   : > { %p362_p6 = scmp.ge.s32.totalorder %s527_s17, 1  ;;  %p105_p7 = scmp.eq.s32.totalorder %s102_s23, 0 }
   0xb   : > { %p599_p8 = por %p124_p5, %p123_p3  ;;  %p161_p9 = scmp.lt.s32.totalorder %s527_s17, 3 }
   0xc   : > { %s605_s25 = scalar_select %p105_p7, %s515_s14, %s107_s21  }
   0xd   : > { %p162_p10 = pnand %p362_p6, %p161_p9 }
   0xe   : > { %p190_p11 = scmp.lt.s32.totalorder (!%p162_p10), %s519_s15, 1  ;;  %s186_s26 = sand.u32 (!%p162_p10), 1, %s511_s13  }
   0xf   : > { %165 = sbr.rel (%p162_p10) target bundleno = 50 (0x32), region = 32  ;;  %s363_s28 = sshll.u32 (!%p162_p10), %s186_s26, 6 }
  0x10   : > { %s621_s10 = scalar_lea.vmem (!%p162_p10), [#allocation2], %s363_s28  ;;  %s374_s18 = sshll.u32 (!%p162_p10), %s519_s15, 10 }
  0x11   : > { %s279_s11 = sshll.u32 (!%p162_p10), %s621_s10, 4  ;;  %s630_s21 = scalar_lea.hbm (!%p162_p10), %s698_s3, %s374_s18  ;;  %s625_s11 = int_to_ptr.vmem [resolvable:$true] %s279_s11 }
  0x12   : > { %s650_s23 = scalar_lea.sflag (!%p162_p10), [#allocation3], %s186_s26  ;;  %s529_s28 = smov (!%p162_p10), [#allocation2]  }
  0x14   : > { %s191_s27 = scalar_select %p190_p11, %s519_s15, 1  ;;  %v366_v0 = vld [vmem:[%s696_s1] ss:$0 sm:$0xff]  ;;  %vm254_vm0 = vcmask 261120  }
  0x15   : > { %v367_v9 = vld [vmem:[%s697_s2] ss:$0 sm:$0xff] }
  0x16   : > { %s373_s29 = sshll.u32 %s191_s27, 5  ;;  %s451_s27 = scalar_lea.vmem %s625_s11, 1024 }
  0x17   : > { %s197_s5 = scalar_lea.vmem %s695_s0, %s373_s29  ;;  %p452_p12 = scmp.ne.s32.totalorder %s625_s11, %s451_s27 }
  0x18   : > { %v376_v1 = vld [vmem:[%s197_s5] sm:$0xff]   ;;  %v391_v2 = vld [vmem:[%s197_s5 + $0x8] sm:$0xff]   ;;  %v392_v3 = vld [vmem:[%s197_s5 + $0x10] sm:$0xff]   ;;  %s455_s29 = sshll.u32 %s529_s28, 4  ;;  %s456_s29 = int_to_ptr.vmem [resolvable:$false] %s455_s29 }
  0x19   : > { %v377_v4 = vunpack.c.l.bf16 %v376_v1  ;;  %v378_v5 = vunpack.c.h.bf16 %v376_v1  ;;  %v381_v6 = vunpack.c.l.bf16 %v391_v2  ;;  %v382_v7 = vunpack.c.h.bf16 %v391_v2  ;;  %v393_v8 = vld [vmem:[%s197_s5 + $0x18] sm:$0xff]   ;;  %p453_p13 = pnand %p452_p12, %p592_p4  ;;  %s457_s30 = scalar_lea.vmem %s456_s29, 2048 }
  0x1a   : > { %v385_v10 = vunpack.c.l.bf16 %v392_v3  ;;  %v386_v11 = vunpack.c.h.bf16 %v392_v3  ;;  %v389_v12 = vunpack.c.l.bf16 %v393_v8  ;;  %v390_v13 = vunpack.c.h.bf16 %v393_v8  ;;  %p458_p1 = scmp.lt.s32.totalorder %s625_s11, %s456_s29  ;;  %p459_p2 = scmp.lt.s32.totalorder %s457_s30, %s451_s27 }
  0x1b   : > { %v223_v14 = vmul.f32 %v377_v4, %v366_v0  ;;  %v224_v15 = vmul.f32 %v378_v5, %v366_v0  ;;  %v225_v16 = vmul.f32 %v381_v6, %v366_v0  ;;  %v226_v17 = vmul.f32 %v382_v7, %v366_v0  ;;  %p454_p0 = pneg %p453_p13 }
  0x1c   : > { %v227_v18 = vmul.f32 %v385_v10, %v366_v0  ;;  %v228_v19 = vmul.f32 %v386_v11, %v366_v0  ;;  %v229_v20 = vmul.f32 %v389_v12, %v366_v0  ;;  %v230_v21 = vmul.f32 %v390_v13, %v366_v0  ;;  %p460_p3 = por %p459_p2, %p458_p1 }
  0x1d   : > { %v238_v22 = vadd.f32 %v367_v9, %v223_v14  ;;  %v239_v23 = vadd.f32 %v367_v9, %v224_v15  ;;  %v240_v24 = vadd.f32 %v367_v9, %v225_v16  ;;  %v241_v25 = vadd.f32 %v367_v9, %v226_v17 }
  0x1e   : > { %v242_v26 = vadd.f32 %v367_v9, %v227_v18  ;;  %v243_v27 = vadd.f32 %v367_v9, %v228_v19  ;;  %v244_v28 = vadd.f32 %v367_v9, %v229_v20  ;;  %v245_v29 = vadd.f32 %v367_v9, %v230_v21  ;;  %p461_p5 = pnand %p460_p3, %p454_p0 }
  0x1f   : > { %v246_v30 = vmax.f32 %v238_v22, 0.0  ;;  %v247_v31 = vmax.f32 %v239_v23, 0.0  ;;  %v248_v32 = vmax.f32 %v240_v24, 0.0  ;;  %v249_v33 = vmax.f32 %v241_v25, 0.0 }
  0x20   : > { %v250_v34 = vmax.f32 %v242_v26, 0.0  ;;  %v251_v35 = vmax.f32 %v243_v27, 0.0  ;;  %v252_v36 = vmax.f32 %v244_v28, 0.0  ;;  %v253_v37 = vmax.f32 %v245_v29, 0.0 }
  0x21   : > { %255 = vst.msk [vmem:[%s621_s10] sm:$0xff] %vm254_vm0, %v246_v30  ;;  %256 = vst.msk [vmem:[%s621_s10 + $0x8] sm:$0xff] %vm254_vm0, %v247_v31 }
  0x22   : > { %257 = vst.msk [vmem:[%s621_s10 + $0x10] sm:$0xff] %vm254_vm0, %v248_v32  ;;  %258 = vst.msk [vmem:[%s621_s10 + $0x18] sm:$0xff] %vm254_vm0, %v249_v33 }
  0x23   : > { %259 = vst.msk [vmem:[%s621_s10 + $0x20] sm:$0xff] %vm254_vm0, %v250_v34  ;;  %260 = vst.msk [vmem:[%s621_s10 + $0x28] sm:$0xff] %vm254_vm0, %v251_v35 }
  0x24   : > { %261 = vst.msk [vmem:[%s621_s10 + $0x30] sm:$0xff] %vm254_vm0, %v252_v36  ;;  %262 = vst.msk [vmem:[%s621_s10 + $0x38] sm:$0xff] %vm254_vm0, %v253_v37 }
  0x25   : > { %464 = shalt.err (!%p461_p5)
}
  0x26   : > { %s465_s26 = scalar_lea.hbm %s630_s21, 1024  ;;  %s469_s6 = scalar_lea.hbm %s698_s3, 2048 }
  0x27   : > { %p466_p6 = scmp.ne.s32.totalorder %s630_s21, %s465_s26  ;;  %p470_p10 = scmp.lt.s32.totalorder %s630_s21, %s698_s3 }
  0x28   : > { %p471_p11 = scmp.lt.s32.totalorder %s469_s6, %s465_s26 }
  0x29   : > { %p467_p7 = pnand %p466_p6, %p592_p4 }
  0x2a   : > { %p472_p12 = por %p471_p11, %p470_p10 }
  0x2b   : > { %p468_p9 = pneg %p467_p7 }
  0x2d   : > { %p473_p13 = pnand %p472_p12, %p468_p9 }
  0x2f   : > { %476 = shalt.err (!%p473_p13)
}
  0x30   : > { %s530_s9 = smov 128   ;;  %s531_s10 = smov 8  }
  0x31   : > { %394 = dma.vmem_to_hbm [thread:$0]  (%p592_p4), %s625_s11, 1024, %s630_s21, %s650_s23, %s530_s9, %s530_s9, %s531_s10  }
  0x32 PF: > { %p400_p0 = scmp.ge.s32.totalorder %s527_s17, 2  ;;  %s294_s18 = sand.u32 1, %s507_s12  }
  0x33   : > { %s295_s15 = scalar_lea.sflag [#allocation3], %s294_s18 }
  0x34   : > { %p397_p1 = pnand %p400_p0, %p599_p8 }
  0x36   : > { %p398_p2 = pneg %p397_p1 }
  0x38   : > { %502 = dma.done.wait (%p398_p2), %s295_s15, 1024  }
  0x39   : > { %504 = vsyncadd (%p398_p2), %s295_s15, 4294966272  ;;  %s16_s17 = sadd.s32 1, %s527_s17   ;;  %s701_s12 = smov %s511_s13 }
  0x3a   : > { %p13_p3 = scmp.ge.s32.totalorder %s16_s17, 4   ;;  %s702_s13 = smov %s515_s14 }
  0x3b   : > { %s703_s14 = smov %s605_s25  ;;  %s704_s15 = smov %s523_s16 }
  0x3c   : > { %s705_s16 = smov %s707_s20  ;;  %15 = sbr.rel (!%p13_p3) target bundleno = 4 (0x4), region = 67 }
  0x41   :  { %300 = vsyncpa [#allocation3], 1 }
  0x42   :  { %302 = vsyncpa [#allocation3 + $0x1], 1 }

// kernel: stage2_forward.2
= control target key start
LH: loop header
LB: loop body
LE: loop exit
PB: predicated region body
PF: predicated region fallthrough
CT: control target
= control target key end

     0   :  { %s1156_s15 = smov 0   ;;  %s1158_s16 = smov 0   ;;  %s1319_s0 = inlined_call_operand.vmem [shape: bf16[2,10,10,8], index: 0, kind: input, shape index: {}]   ;;  %s1320_s1 = inlined_call_operand.vmem [shape: bf16[4,8,32], index: 1, kind: input, shape index: {}]   ;;  %s1321_s2 = inlined_call_operand.vmem [shape: bf16[2,8,8,32], index: 2, kind: output, shape index: {0}]   ;;  %s1322_s3 = inlined_call_operand.vmem [shape: f32[2,1,1,32], index: 3, kind: output, shape index: {1}]   ;;  %s1323_s4 = inlined_call_operand.vmem [shape: f32[2,1,1,32], index: 4, kind: output, shape index: {2}]  }
   0x1   :  { %s1160_s17 = smov 0  }
   0x2 LB: > { %s27_s18 = sadd.s32 1, %s1125_s16  ;;  %p951_p0 = scmp.ge.s32.totalorder %s1129_s17, 1  ;;  %s1129_s17 = sphi %s1160_s17, %s15_s17   ;;  %s1125_s16 = sphi %s1158_s16, %s1327_s16   ;;  %s1121_s15 = sphi %s1156_s15, %s1326_s15  }
   0x3   : > { %p29_p1 = scmp.ge.s32.totalorder %s27_s18, 2  ;;  %p185_p2 = scmp.lt.s32.totalorder %s1129_s17, 3 }
   0x5   : > { %s1329_s18 = smov (%p29_p1, %s27_s18), 0  ;;  %p186_p3 = pnand %p951_p0, %p185_p2 }
   0x6   : > { %p227_p4 = scmp.lt.s32.totalorder (!%p186_p3), %s1121_s15, 1 }
   0x7   : > { %189 = sbr.rel (%p186_p3) target bundleno = 275 (0x113), region = 28 }
   0xc   : > { %v342_v0 = vld [vmem:[%s1320_s1] sm:$0xf]  ;;  %vm370_vm0 = vcmask 1043456   ;;  %v965_v1 = vld [vmem:[%s1320_s1 + $0x4] sm:$0xf]  ;;  %s1331_s15 = smov (!%p227_p4, %s1121_s15), 1 }
   0xd   : > { %1074 = vmatprep.subr.msk.bf16.mxu1 %vm370_vm0, %v342_v0  ;;  %v464_v2 = vsel %vm370_vm0, %v342_v0, 0  ;;  %1073 = vmatprep.subr.msk.bf16.mxu0 %vm370_vm0, %v965_v1  ;;  %v372_v3 = vsel %vm370_vm0, %v965_v1, 0  ;;  %v982_v4 = vld [vmem:[%s1320_s1 + $0x8] sm:$0xf]  ;;  %v988_v5 = vld [vmem:[%s1320_s1 + $0xc] sm:$0xf]  ;;  %s247_s11 = scalar_lea.vmem %s1322_s3, %s1331_s15  ;;  %s253_s14 = scalar_lea.vmem %s1323_s4, %s1331_s15 }
   0xe   : > { %1044 = vmatpush3.bf16.msra.mxu1 %v464_v2  ;;  %1034 = vmatpush3.bf16.msra.mxu0 %v372_v3  ;;  %s1077_s27 = smul.u32 80, %s1331_s15  ;;  %vm357_vm1 = vcmask 64512   ;;  %vm295_vm2 = vcmask 1042432   ;;  %vm296_vm3 = vcmask 1046532   ;;  %v540_v6 = vsel %vm370_vm0, %v982_v4, 0  ;;  %s1004_s5 = sshll.u32 %s1331_s15, 5 }
   0xf   : > { %1075 = vmatprep.subr.msk.bf16.mxu0 %vm370_vm0, %v982_v4  ;;  %1076 = vmatprep.subr.msk.bf16.mxu1 %vm370_vm0, %v988_v5  ;;  %v624_v14 = vsel %vm370_vm0, %v988_v5, 0  ;;  %vm1210_vm4 = vmor %vm295_vm2, %vm296_vm3  ;;  %s1268_s8 = scalar_lea.vmem %s1321_s2, %s1004_s5  ;;  %vm785_vm5 = vcmask 257024   ;;  %vm699_vm6 = vcmask 261120   ;;  %vm721_vm7 = vcmask 253952  }
  0x10   : > { %s1198_s30 = scalar_lea.vmem %s1319_s0, %s1077_s27 }
  0x11   : > { %v259_v7 = vld [vmem:[%s1198_s30] sm:$0xf]  ;;  %v261_v8 = vld [vmem:[%s1198_s30 + $0x8] sm:$0xf]  ;;  %v263_v9 = vld [vmem:[%s1198_s30 + $0x10] sm:$0xf] }
  0x12   : > { %v955_v10 = vrot.slane %v259_v7, 9  ;;  %v956_v11 = vrot.slane %v261_v8, 9  ;;  %v974_v12 = vcombine.low %v259_v7, %v261_v8  ;;  %v265_v13 = vld [vmem:[%s1198_s30 + $0x18] sm:$0xf]  ;;  %v957_v15 = vrot.slane %v263_v9, 9 }
  0x13   : > { %v958_v16 = vrot.slane %v265_v13, 9  ;;  %v975_v17 = vcombine.low %v263_v9, %v265_v13  ;;  %v260_v18 = vld [vmem:[%s1198_s30 + $0x4] sm:$0x1]  ;;  %v262_v19 = vld [vmem:[%s1198_s30 + $0xc] sm:$0x1] }
  0x14   : > { %1045 = vmatprep.mubr.msk.bf16.mxu1 %vm357_vm1, %v974_v12  ;;  %v300_v21 = vrot.slane %v260_v18, 5  ;;  %v304_v22 = vrot.slane %v262_v19, 5  ;;  %v264_v23 = vld [vmem:[%s1198_s30 + $0x14] sm:$0x1]  ;;  %v266_v24 = vld [vmem:[%s1198_s30 + $0x1c] sm:$0x1] }
  0x15   : > { %1046 = vmatmul.mubr.msk.bf16.vlgmr.msra.gmra.mxu1 %vm357_vm1, %v975_v17  ;;  %v308_v25 = vrot.slane %v264_v23, 5  ;;  %v312_v26 = vrot.slane %v266_v24, 5  ;;  %v267_v27 = vld [vmem:[%s1198_s30 + $0x20] sm:$0xf]  ;;  %v269_v28 = vld [vmem:[%s1198_s30 + $0x28] sm:$0xf] }
  0x16   : > { %v301_v29 = vsel %vm1210_vm4, %v955_v10, %v300_v21  ;;  %v305_v30 = vsel %vm1210_vm4, %v956_v11, %v304_v22  ;;  %1064 = vmatpush3.bf16.msra.mxu1 %v624_v14  ;;  %v959_v31 = vrot.slane %v267_v27, 9  ;;  %v960_v32 = vrot.slane %v269_v28, 9  ;;  %v271_v33 = vld [vmem:[%s1198_s30 + $0x30] sm:$0xf]  ;;  %v273_v34 = vld [vmem:[%s1198_s30 + $0x38] sm:$0xf] }
  0x17   : > { %v966_v35 = vcombine.low %v301_v29, %v305_v30  ;;  %v309_v36 = vsel %vm1210_vm4, %v957_v15, %v308_v25  ;;  %v313_v37 = vsel %vm1210_vm4, %v958_v16, %v312_v26  ;;  %v976_v38 = vcombine.low %v267_v27, %v269_v28  ;;  %v268_v39 = vld [vmem:[%s1198_s30 + $0x24] sm:$0x1]  ;;  %v270_v40 = vld [vmem:[%s1198_s30 + $0x2c] sm:$0x1]  ;;  %v272_v41 = vld [vmem:[%s1198_s30 + $0x34] sm:$0x1] }
  0x18   : > { %v967_v42 = vcombine.low %v309_v36, %v313_v37  ;;  %v961_v43 = vrot.slane %v271_v33, 9  ;;  %v962_v44 = vrot.slane %v273_v34, 9  ;;  %v977_v45 = vcombine.low %v271_v33, %v273_v34  ;;  %v274_v46 = vld [vmem:[%s1198_s30 + $0x3c] sm:$0x1]  ;;  %v275_v57 = vld [vmem:[%s1198_s30 + $0x40] sm:$0xf] }
  0x19   : > { %1035 = vmatprep.mubr.msk.bf16.mxu0 %vm357_vm1, %v966_v35  ;;  %1049 = vmatprep.mubr.msk.bf16.mxu1 %vm357_vm1, %v976_v38  ;;  %v316_v47 = vrot.slane %v268_v39, 5  ;;  %v320_v48 = vrot.slane %v270_v40, 5  ;;  %v324_v49 = vrot.slane %v272_v41, 5  ;;  %v328_v50 = vrot.slane %v274_v46, 5  ;;  %v276_v58 = vld [vmem:[%s1198_s30 + $0x44] sm:$0x1] }
  0x1a   : > { %1036 = vmatmul.mubr.msk.bf16.vlgmr.msra.gmra.mxu0 %vm357_vm1, %v967_v42  ;;  %v277_v59 = vld [vmem:[%s1198_s30 + $0x48] sm:$0xf]  ;;  %v278_v60 = vld [vmem:[%s1198_s30 + $0x4c] sm:$0x1]  ;;  %v963_v61 = vrot.slane %v275_v57, 9  ;;  %v336_v62 = vrot.slane %v276_v58, 5 }
  0x1b   : > { %1054 = vmatpush3.bf16.msra.mxu0 %v540_v6  ;;  %v317_v51 = vsel %vm1210_vm4, %v959_v31, %v316_v47  ;;  %v321_v52 = vsel %vm1210_vm4, %v960_v32, %v320_v48  ;;  %v325_v53 = vsel %vm1210_vm4, %v961_v43, %v324_v49  ;;  %v329_v54 = vsel %vm1210_vm4, %v962_v44, %v328_v50 }
  0x1c   : > { %v968_v55 = vcombine.low %v317_v51, %v321_v52  ;;  %v969_v56 = vcombine.low %v325_v53, %v329_v54  ;;  %v964_v63 = vrot.slane %v277_v59, 9  ;;  %v340_v0 = vrot.slane %v278_v60, 5 }
  0x1d   : > { %1050 = vmatmul.mubr.msk.bf16.gmra.mxu1 %vm357_vm1, %v977_v45  ;;  %v337_v1 = vsel %vm1210_vm4, %v963_v61, %v336_v62  ;;  %v983_v4 = vcombine.low %v275_v57, %v277_v59 }
  0x1e   : > { %1039 = vmatprep.mubr.msk.bf16.mxu0 %vm357_vm1, %v968_v55  ;;  %1065 = vmatprep.mubr.msk.bf16.mxu1 %vm357_vm1, %v967_v42  ;;  %v341_v2 = vsel %vm1210_vm4, %v964_v63, %v340_v0 }
  0x1f   : > { %v989_v3 = vcombine.low %v337_v1, %v341_v2 }
  0x22   : > { %1040 = vmatmul.mubr.msk.bf16.gmra.mxu0 %vm357_vm1, %v969_v56 }
  0x23   : > { %1055 = vmatprep.mubr.msk.bf16.mxu0 %vm357_vm1, %v975_v17 }
  0x25   : > { %1066 = vmatmul.mubr.msk.bf16.vlgmr.msra.gmra.mxu1 %vm357_vm1, %v968_v55 }
  0x26   : > { %1069 = vmatprep.mubr.msk.bf16.mxu1 %vm357_vm1, %v969_v56 }
  0x2a   : > { %1056 = vmatmul.mubr.msk.bf16.vlgmr.msra.gmra.mxu0 %vm357_vm1, %v976_v38 }
  0x2b   : > { %1059 = vmatprep.mubr.msk.bf16.mxu0 %vm357_vm1, %v977_v45 }
  0x2d   : > { %1070 = vmatmul.mubr.msk.bf16.gmra.mxu1 %vm357_vm1, %v989_v3 }
  0x32   : > { %1060 = vmatmul.mubr.msk.bf16.gmra.mxu0 %vm357_vm1, %v983_v4 }
  0xd5   : > { %v1047_v5 = vpop.f32.mrf.mxu1 }
  0xd7   : > { %v500_v6 = vpop.f32.mrf.mxu1 }
  0xd9   : > { %v1048_v7 = vpop.f32.mrf.mxu1 }
  0xda   : > { %v1037_v8 = vpop.f32.mrf.mxu0 }
  0xdb   : > { %v503_v9 = vpop.f32.mrf.mxu1  ;;  %v509_v23 = vadd.f32 %v1047_v5, %v1037_v8 }
  0xdc   : > { %v408_v10 = vpop.f32.mrf.mxu0 }
  0xdd   : > { %v1051_v11 = vpop.f32.mrf.mxu1  ;;  %v501_v26 = vadd.f32 %v500_v6, %v408_v10 }
  0xde   : > { %v1038_v12 = vpop.f32.mrf.mxu0 }
  0xdf   : > { %v516_v13 = vpop.f32.mrf.mxu1  ;;  %v512_v32 = vadd.f32 %v1048_v7, %v1038_v12 }
  0xe0   : > { %v411_v14 = vpop.f32.mrf.mxu0 }
  0xe1   : > { %v1052_v15 = vpop.f32.mrf.mxu1  ;;  %v504_v37 = vadd.f32 %v503_v9, %v411_v14 }
  0xe2   : > { %v1041_v16 = vpop.f32.mrf.mxu0 }
  0xe3   : > { %v519_v17 = vpop.f32.mrf.mxu1  ;;  %v525_v40 = vadd.f32 %v1051_v11, %v1041_v16 }
  0xe4   : > { %v424_v18 = vpop.f32.mrf.mxu0 }
  0xe5   : > { %v1067_v19 = vpop.f32.mrf.mxu1  ;;  %v517_v46 = vadd.f32 %v516_v13, %v424_v18 }
  0xe6   : > { %v1042_v20 = vpop.f32.mrf.mxu0 }
  0xe7   : > { %v660_v21 = vpop.f32.mrf.mxu1  ;;  %v528_v49 = vadd.f32 %v1052_v15, %v1042_v20 }
  0xe8   : > { %v427_v22 = vpop.f32.mrf.mxu0 }
  0xe9   : > { %v1068_v24 = vpop.f32.mrf.mxu1  ;;  %v520_v53 = vadd.f32 %v519_v17, %v427_v22 }
  0xea   : > { %v1057_v25 = vpop.f32.mrf.mxu0 }
  0xeb   : > { %v609_v27 = vadd.f32 %v1057_v25, %v509_v23  ;;  %v663_v28 = vpop.f32.mrf.mxu1 }
  0xec   : > { %v576_v29 = vpop.f32.mrf.mxu0 }
  0xed   : > { %v693_v30 = vadd.f32 %v1067_v19, %v609_v27  ;;  %v607_v31 = vadd.f32 %v576_v29, %v501_v26  ;;  %v1071_v34 = vpop.f32.mrf.mxu1 }
  0xee   : > { %v1058_v33 = vpop.f32.mrf.mxu0 }
  0xef   : > { %v1007_v35 = vpack.c.bf16 %v693_v30, %v693_v30  ;;  %v691_v36 = vadd.f32 %v660_v21, %v607_v31  ;;  %v610_v38 = vadd.f32 %v1058_v33, %v512_v32  ;;  %v676_v44 = vpop.f32.mrf.mxu1  ;;  %v725_v54 = vmul.f32 %v693_v30, %v693_v30 }
  0xf0   : > { %v579_v39 = vpop.f32.mrf.mxu0  ;;  %v703_v63 = vsel %vm699_vm6, %v693_v30, 0.0 }
  0xf1   : > { %788 = vst.msk [vmem:[%s1268_s8 + $0x8] sm:$0xf] %vm785_vm5, %v1007_v35  ;;  %v1005_v41 = vpack.c.bf16 %v691_v36, %v691_v36  ;;  %v694_v42 = vadd.f32 %v1068_v24, %v610_v38  ;;  %v608_v43 = vadd.f32 %v579_v39, %v504_v37  ;;  %v723_v47 = vmul.f32 %v691_v36, %v691_v36  ;;  %v1072_v61 = vpop.f32.mrf.mxu1 }
  0xf2   : > { %v1061_v45 = vpop.f32.mrf.mxu0  ;;  %v700_v57 = vsel %vm699_vm6, %v691_v36, 0.0  ;;  %v734_v8 = vsel %vm699_vm6, %v725_v54, 0.0 }
  0xf3   : > { %786 = vst.msk [vmem:[%s1268_s8] sm:$0xf] %vm785_vm5, %v1005_v41  ;;  %v613_v48 = vadd.f32 %v1061_v45, %v525_v40  ;;  %v1008_v50 = vpack.c.bf16 %v694_v42, %v694_v42  ;;  %v692_v51 = vadd.f32 %v663_v28, %v608_v43  ;;  %v731_v0 = vsel %vm699_vm6, %v723_v47, 0.0  ;;  %v679_v15 = vpop.f32.mrf.mxu1 }
  0xf4   : > { %v592_v52 = vpop.f32.mrf.mxu0  ;;  %v726_v3 = vmul.f32 %v694_v42, %v694_v42  ;;  %v705_v12 = vsel %vm699_vm6, %v694_v42, 0.0 }
  0xf5   : > { %v697_v55 = vadd.f32 %v1071_v34, %v613_v48  ;;  %v611_v56 = vadd.f32 %v592_v52, %v517_v46  ;;  %789 = vst.msk [vmem:[%s1268_s8 + $0xc] sm:$0xf] %vm785_vm5, %v1008_v50  ;;  %v701_v58 = vsel %vm699_vm6, %v692_v51, 0.0  ;;  %v724_v59 = vmul.f32 %v692_v51, %v692_v51 }
  0xf6   : > { %v1006_v60 = vpack.c.bf16 %v692_v51, %v692_v51  ;;  %v1062_v62 = vpop.f32.mrf.mxu0  ;;  %v702_v1 = vadd.f32 %v701_v58, %v700_v57  ;;  %v736_v20 = vsel %vm699_vm6, %v726_v3, 0.0 }
  0xf7   : > { %v1011_v2 = vpack.c.bf16 %v697_v55, %v697_v55  ;;  %v732_v4 = vsel %vm699_vm6, %v724_v59, 0.0  ;;  %v695_v5 = vadd.f32 %v676_v44, %v611_v56  ;;  %v614_v6 = vadd.f32 %v1062_v62, %v528_v49 }
  0xf8   : > { %787 = vst.msk [vmem:[%s1268_s8 + $0x4] sm:$0xf] %vm785_vm5, %v1006_v60  ;;  %v595_v7 = vpop.f32.mrf.mxu0  ;;  %v704_v9 = vadd.f32 %v703_v63, %v702_v1  ;;  %v733_v10 = vadd.f32 %v732_v4, %v731_v0  ;;  %v729_v27 = vmul.f32 %v697_v55, %v697_v55  ;;  %v711_v33 = vsel %vm699_vm6, %v697_v55, 0.0 }
  0xf9   : > { %792 = vst.msk [vmem:[%s1268_s8 + $0x18] sm:$0xf] %vm785_vm5, %v1011_v2  ;;  %v612_v11 = vadd.f32 %v595_v7, %v520_v53  ;;  %v727_v13 = vmul.f32 %v695_v5, %v695_v5  ;;  %v1009_v14 = vpack.c.bf16 %v695_v5, %v695_v5  ;;  %v698_v16 = vadd.f32 %v1072_v61, %v614_v6 }
  0xfa   : > { %v735_v17 = vadd.f32 %v734_v8, %v733_v10  ;;  %v706_v18 = vadd.f32 %v705_v12, %v704_v9  ;;  %v707_v21 = vsel %vm699_vm6, %v695_v5, 0.0  ;;  %v742_v37 = vsel %vm699_vm6, %v729_v27, 0.0 }
  0xfb   : > { %v696_v19 = vadd.f32 %v679_v15, %v612_v11  ;;  %790 = vst.msk [vmem:[%s1268_s8 + $0x10] sm:$0xf] %vm785_vm5, %v1009_v14  ;;  %v1012_v22 = vpack.c.bf16 %v698_v16, %v698_v16  ;;  %v738_v28 = vsel %vm699_vm6, %v727_v13, 0.0  ;;  %v730_v34 = vmul.f32 %v698_v16, %v698_v16 }
  0xfc   : > { %v708_v23 = vadd.f32 %v707_v21, %v706_v18  ;;  %v737_v24 = vadd.f32 %v736_v20, %v735_v17  ;;  %v713_v38 = vsel %vm699_vm6, %v698_v16, 0.0 }
  0xfd   : > { %v709_v25 = vsel %vm699_vm6, %v696_v19, 0.0  ;;  %v728_v26 = vmul.f32 %v696_v19, %v696_v19  ;;  %793 = vst.msk [vmem:[%s1268_s8 + $0x1c] sm:$0xf] %vm785_vm5, %v1012_v22  ;;  %v1010_v29 = vpack.c.bf16 %v696_v19, %v696_v19  ;;  %v744_v41 = vsel %vm699_vm6, %v730_v34, 0.0 }
  0xfe   : > { %v739_v30 = vadd.f32 %v738_v28, %v737_v24  ;;  %v710_v31 = vadd.f32 %v709_v25, %v708_v23 }
  0xff   : > { %v740_v32 = vsel %vm699_vm6, %v728_v26, 0.0  ;;  %791 = vst.msk [vmem:[%s1268_s8 + $0x14] sm:$0xf] %vm785_vm5, %v1010_v29 }
 0x100   : > { %v712_v35 = vadd.f32 %v711_v33, %v710_v31  ;;  %v741_v36 = vadd.f32 %v740_v32, %v739_v30 }
 0x102   : > { %v714_v39 = vadd.f32 %v713_v38, %v712_v35  ;;  %v743_v40 = vadd.f32 %v742_v37, %v741_v36 }
 0x104   : > { %v715_v42 = vrot.slane %v714_v39, 4  ;;  %v745_v43 = vadd.f32 %v744_v41, %v743_v40 }
 0x106   : > { %v716_v44 = vadd.f32 %v715_v42, %v714_v39  ;;  %v746_v45 = vrot.slane %v745_v43, 4 }
 0x108   : > { %v717_v46 = vrot.slane %v716_v44, 2  ;;  %v747_v47 = vadd.f32 %v746_v45, %v745_v43 }
 0x10a   : > { %v718_v48 = vadd.f32 %v717_v46, %v716_v44  ;;  %v748_v49 = vrot.slane %v747_v47, 2 }
 0x10c   : > { %v719_v50 = vrot.slane %v718_v48, 1  ;;  %v749_v51 = vadd.f32 %v748_v49, %v747_v47 }
 0x10e   : > { %v720_v52 = vadd.f32 %v719_v50, %v718_v48  ;;  %v750_v53 = vrot.slane %v749_v51, 1 }
 0x110   : > { %722 = vst.msk [vmem:[%s247_s11] sm:$0x1] %vm721_vm7, %v720_v52  ;;  %v751_v54 = vadd.f32 %v750_v53, %v749_v51 }
 0x112   : > { %752 = vst.msk [vmem:[%s253_s14] sm:$0x1] %vm721_vm7, %v751_v54 }
 0x113 PF: > { %s15_s17 = sadd.s32 1, %s1129_s17   ;;  %s1326_s15 = smov %s1125_s16 }
 0x114   : > { %p12_p5 = scmp.ge.s32.totalorder %s15_s17, 4   ;;  %s1327_s16 = smov %s1329_s18 }
 0x116   :  { %14 = sbr.rel (!%p12_p5) target bundleno = 2 (0x2), region = 86 }

</bundles_post_ra>
